<compile_context>
chip_gen: v7x
topology: tpu7x:2x2x1
jax: 0.10.0
libtpu: 0.0.40
codegen_flags: <defaults>
</compile_context>

<pallas_src>
import functools

import jax
import jax.numpy as jnp
import numpy as np
from jax.experimental import pallas as pl
from jax.experimental.pallas import tpu as pltpu


def _round_up(x, m):
    return (x + m - 1) // m * m


def _pick_vmem_limit():
    """Per-generation VMEM budget: ~3/4 of capacity (48 MiB v7x, 96 MiB v5e/v6e)."""
    try:
        cap = int(pltpu.get_tpu_info().vmem_capacity_bytes)
    except Exception:
        cap = 64 * 1024 * 1024  # conservative default (v7x per-TensorCore)
    return min(cap * 3 // 4, 112 * 1024 * 1024)


def _conv_bn_relu_kernel(x_ref, w_ref, b_ref, o_ref, acc_ref,
                         *, kh, wpa, stride, tm):
    """One (image, C_out tile, M tile) grid step of conv + folded-BN bias + ReLU.

    x_ref  : (FLAT, KW*C_in)     bf16  width-folded, zero-padded image; pixel
                                       (row y, col x) lives at flat index y*WPA + x
    w_ref  : (KH, KW*C_in, TCO)  bf16  BN-scale-folded weights
    b_ref  : (1, TCO)            f32   folded BN bias
    o_ref  : (TM, TCO)           bf16  output tile (flat index oy*WPA + ox)
    acc_ref: (TM, TCO)           f32   VMEM accumulator scratch
    """
    m0 = pl.program_id(2) * tm                      # flat output start of this M tile
    for i in range(kh):                             # static unroll over kernel rows
        # Output flat index m needs input flat row stride*m + i*WPA.
        # WPA and TM are multiples of 8 -> sublane-aligned read starts.
        start = pl.multiple_of(stride * m0 + i * wpa, 8)
        if stride == 1:
            xs = x_ref[pl.ds(start, tm), :]                      # (TM, KW*C_in)
        else:
            # In-kernel stride handling: strided sublane read (no stride^2 waste).
            xs = x_ref[pl.ds(start, tm, stride), :]
        contrib = jnp.dot(xs, w_ref[i], preferred_element_type=jnp.float32)
        if i == 0:
            acc_ref[...] = contrib
        else:
            acc_ref[...] += contrib
    y = acc_ref[...] + b_ref[...]                   # (TM, TCO) + (1, TCO)
    o_ref[...] = jnp.maximum(y, 0.0).astype(o_ref.dtype)


@functools.partial(
    jax.jit, static_argnames=("stride", "padding", "eps", "tile_m", "tile_cout"))
def basic_conv2d(x, weight, gamma, beta, running_mean, running_var,
                 *, stride, padding, eps=1e-3, tile_m=512, tile_cout=128):
    """x: (N, C_in, H, W) f32; weight: (C_out, C_in, KH, KW) f32.  Returns NCHW f32."""
    if tile_cout % 128:
        raise ValueError("tile_cout must be a multiple of 128 (lane-dense stores)")
    n, c_in, h, w = x.shape
    c_out, _, kh, kw = weight.shape
    s = stride

    hp, wp = h + 2 * padding, w + 2 * padding
    wpa = _round_up(wp, 8)                          # 8-aligned output row pitch
    oh = (hp - kh) // s + 1                         # valid output rows
    ow = (wp - kw) // s + 1                         # valid output cols
    kwc = kw * c_in                                 # folded contraction slice (per row tap)

    # ---- M tiling (flattened output index m = oy*WPA + ox; garbage cols sliced off)
    m_total = oh * wpa
    tm = _round_up(min(tile_m, _round_up(m_total, 8)), 8)
    m_pad = _round_up(m_total, tm)
    n_mi = m_pad // tm

    # ---- Input: NCHW -> NHWC, zero-pad, fold KW taps into the channel dim,
    # flatten H*W.  All of this fuses into the single wrapper copy XLA already
    # needed for the layout change + bf16 cast.
    src_w = wpa + kw - 1                            # source columns needed by the fold
    x_nhwc = jnp.transpose(x, (0, 2, 3, 1)).astype(jnp.bfloat16)
    x_p = jnp.pad(x_nhwc, ((0, 0), (padding, padding),
                           (padding, src_w - w - padding), (0, 0)))
    x_fold = jnp.concatenate([x_p[:, :, j:j + wpa, :] for j in range(kw)],
                             axis=-1)               # (N, HP, WPA, KW*C_in)
    x_flat = x_fold.reshape(n, hp * wpa, kwc)
    # Bottom-pad so every in-kernel read (incl. garbage cols / M padding) is in
    # bounds: max flat row touched = s*(m_pad-1) + (kh-1)*wpa.
    flat_needed = s * (m_pad - 1) + (kh - 1) * wpa + 1
    flat_len = max(hp * wpa, flat_needed)
    if flat_len > hp * wpa:
        x_flat = jnp.pad(x_flat, ((0, 0), (0, flat_len - hp * wpa), (0, 0)))
    # TODO(synk): for very large images, halo-tile the input rows instead of
    # keeping the whole (folded) image VMEM-resident per grid step.

    # ---- Weights: fold eval-mode BN scale; reorder to (KH, KW*C_in, C_out_p);
    # pad C_out to a multiple of 128 for full-lane stores.
    scale = gamma / jnp.sqrt(running_var + eps)                       # (C_out,)
    bias = beta - running_mean * scale                                # (C_out,)
    w_f = weight * scale[:, None, None, None]                         # (Co,Ci,KH,KW)
    w_f = jnp.transpose(w_f, (2, 3, 1, 0)).reshape(kh, kwc, c_out)    # lane order j*C+c
    c_out_p = _round_up(c_out, tile_cout)
    n_co = c_out_p // tile_cout
    w_f = jnp.pad(w_f, ((0, 0), (0, 0), (0, c_out_p - c_out))).astype(jnp.bfloat16)
    bias_p = jnp.pad(bias, (0, c_out_p - c_out)).astype(jnp.float32).reshape(1, c_out_p)

    # ---- Grid order heuristic (weight reuse): keep the operand whose repeated
    # re-DMA would cost more resident across the inner loops.  M tiles are
    # innermost either way, so x and the current weight tile stay in VMEM.
    w_bytes = kh * kwc * c_out_p * 2
    img_bytes = flat_len * kwc * 2
    weights_outer = w_bytes * (n - 1) > n * img_bytes * (n_co - 1)
    if weights_outer:
        grid = (n_co, n, n_mi)
        x_map = lambda co, b, mi: (b, 0, 0)
        w_map = lambda co, b, mi: (0, 0, co)
        s_map = lambda co, b, mi: (0, co)
        o_map = lambda co, b, mi: (b, mi, co)
    else:
        grid = (n, n_co, n_mi)
        x_map = lambda b, co, mi: (b, 0, 0)
        w_map = lambda b, co, mi: (0, 0, co)
        s_map = lambda b, co, mi: (0, co)
        o_map = lambda b, co, mi: (b, mi, co)

    kernel = functools.partial(_conv_bn_relu_kernel,
                               kh=kh, wpa=wpa, stride=s, tm=tm)

    out = pl.pallas_call(
        kernel,
        out_shape=jax.ShapeDtypeStruct((n, m_pad, c_out_p), jnp.bfloat16),
        grid_spec=pltpu.PrefetchScalarGridSpec(
            num_scalar_prefetch=0,
            grid=grid,
            in_specs=[
                pl.BlockSpec((None, flat_len, kwc), x_map),
                pl.BlockSpec((kh, kwc, tile_cout), w_map),
                pl.BlockSpec((1, tile_cout), s_map),
            ],
            out_specs=pl.BlockSpec((None, tm, tile_cout), o_map),
            scratch_shapes=[pltpu.VMEM((tm, tile_cout), jnp.float32)],
        ),
        compiler_params=pltpu.CompilerParams(
            dimension_semantics=("parallel", "parallel", "parallel"),
            vmem_limit_bytes=_pick_vmem_limit()),
    )(x_flat, w_f, bias_p)

    # Drop M padding, garbage columns and padded channels; back to NCHW f32 to
    # match the PyTorch module's interface.
    out = out[:, :oh * wpa, :c_out].reshape(n, oh, wpa, c_out)[:, :, :ow, :]
    return jnp.transpose(out, (0, 3, 1, 2)).astype(jnp.float32)


def _reference(x, weight, gamma, beta, running_mean, running_var,
               *, stride, padding, eps=1e-3):
    y = jax.lax.conv_general_dilated(
        x, weight, window_strides=(stride, stride),
        padding=[(padding, padding), (padding, padding)],
        dimension_numbers=("NCHW", "OIHW", "NCHW"))
    scale = gamma / jnp.sqrt(running_var + eps)
    s = scale.reshape(1, -1, 1, 1)
    b = (beta - running_mean * scale).reshape(1, -1, 1, 1)
    return jnp.maximum(y * s + b, 0.0)


if __name__ == "__main__":
    # BasicConv2d(in_planes=4, out_planes=8, kernel_size=3, stride=1, padding=1)
    N, C_IN, H, W = 2, 4, 16, 16
    C_OUT, KH, KW = 8, 3, 3
    STRIDE, PADDING = 1, 1

    key = jax.random.PRNGKey(0)
    kx, kw_, kg, kb, km, kv = jax.random.split(key, 6)

    x = jax.random.normal(kx, (N, C_IN, H, W), dtype=jnp.float32)
    weight = jax.random.normal(kw_, (C_OUT, C_IN, KH, KW), dtype=jnp.float32) * 0.1
    gamma = 1.0 + 0.1 * jax.random.normal(kg, (C_OUT,), dtype=jnp.float32)
    beta = 0.1 * jax.random.normal(kb, (C_OUT,), dtype=jnp.float32)
    running_mean = 0.1 * jax.random.normal(km, (C_OUT,), dtype=jnp.float32)
    running_var = jnp.abs(jax.random.normal(kv, (C_OUT,), dtype=jnp.float32)) + 0.5

    out = basic_conv2d(x, weight, gamma, beta, running_mean, running_var,
                       stride=STRIDE, padding=PADDING)
    out = jax.block_until_ready(out)

    ref = _reference(x, weight, gamma, beta, running_mean, running_var,
                     stride=STRIDE, padding=PADDING)
    ref = jax.block_until_ready(ref)

    if out.shape != ref.shape:
        raise AssertionError(f"bad output shape {out.shape} vs {ref.shape}")
    # bf16 inputs/weights/output with f32 accumulation: relaxed tolerance.
    if not np.allclose(np.asarray(out), np.asarray(ref), atol=3e-2, rtol=3e-2):
        err = float(np.max(np.abs(np.asarray(out) - np.asarray(ref))))
        raise AssertionError(f"Pallas kernel does not match reference (max err {err})")

    print("KERNEL_OK")
</pallas_src>

<mosaic_0001>
module attributes {stable_mosaic.version = 11 : i64} {
  func.func @_conv_bn_relu_kernel(%arg0: i32, %arg1: i32, %arg2: i32, %arg3: memref<1x432x12xbf16, #tpu.memory_space<vmem>>, %arg4: memref<3x12x128xbf16, #tpu.memory_space<vmem>>, %arg5: memref<1x128xf32, #tpu.memory_space<vmem>>, %arg6: memref<1x384x128xbf16, #tpu.memory_space<vmem>>, %arg7: memref<384x128xf32, #tpu.memory_space<vmem>>) attributes {dimension_semantics = [#tpu.dimension_semantics<parallel>, #tpu.dimension_semantics<parallel>, #tpu.dimension_semantics<parallel>], iteration_bounds = array<i64: 1, 2, 1>, scalar_prefetch = 0 : i64, scratch_operands = 1 : i64, tpu.core_type = #tpu.core_type<tc>, window_params = [{transform_indices = @transform_0, window_bounds = array<i64: 1, 432, 12>}, {transform_indices = @transform_1, window_bounds = array<i64: 3, 12, 128>}, {transform_indices = @transform_2, window_bounds = array<i64: 1, 128>}, {transform_indices = @transform_3, window_bounds = array<i64: 1, 384, 128>}]} {
    %c384_i32 = arith.constant 384 : i32
    %0 = arith.muli %arg2, %c384_i32 : i32
    %c1_i32 = arith.constant 1 : i32
    %1 = arith.muli %c1_i32, %0 : i32
    %c0_i32 = arith.constant 0 : i32
    %2 = arith.addi %1, %c0_i32 : i32
    %3 = tpu.assume_multiple %2, 8 : i32
    %c0 = arith.constant 0 : index
    %4 = arith.index_cast %3 : i32 to index
    %c0_0 = arith.constant 0 : index
    %5 = vector.load %arg3[%c0, %4, %c0_0] : memref<1x432x12xbf16, #tpu.memory_space<vmem>>, vector<1x384x12xbf16>
    %6 = vector.shape_cast %5 : vector<1x384x12xbf16> to vector<384x12xbf16>
    %c0_1 = arith.constant 0 : index
    %c0_2 = arith.constant 0 : index
    %c0_3 = arith.constant 0 : index
    %7 = vector.load %arg4[%c0_1, %c0_2, %c0_3] : memref<3x12x128xbf16, #tpu.memory_space<vmem>>, vector<1x12x128xbf16>
    %8 = vector.shape_cast %7 : vector<1x12x128xbf16> to vector<12x128xbf16>
    %cst = arith.constant dense<0.000000e+00> : vector<384x128xf32>
    %9 = tpu.matmul %6, %8, %cst {dimension_numbers = #tpu.dot_dimension_numbers<[1], [0], [0], [1], [0, 0, 1, 1], [], []>} : vector<384x12xbf16>, vector<12x128xbf16>, vector<384x128xf32> -> vector<384x128xf32>
    %c0_4 = arith.constant 0 : index
    %c0_5 = arith.constant 0 : index
    %10 = vector.load %arg7[%c0_4, %c0_5] : memref<384x128xf32, #tpu.memory_space<vmem>>, vector<384x128xf32>
    tpu.vector_store %arg7[%c0_4, %c0_5], %9 {strides = array<i32>} : memref<384x128xf32, #tpu.memory_space<vmem>>, vector<384x128xf32>,
    %c1_i32_6 = arith.constant 1 : i32
    %11 = arith.muli %c1_i32_6, %0 : i32
    %c24_i32 = arith.constant 24 : i32
    %12 = arith.addi %11, %c24_i32 : i32
    %13 = tpu.assume_multiple %12, 8 : i32
    %c0_7 = arith.constant 0 : index
    %14 = arith.index_cast %13 : i32 to index
    %c0_8 = arith.constant 0 : index
    %15 = vector.load %arg3[%c0_7, %14, %c0_8] : memref<1x432x12xbf16, #tpu.memory_space<vmem>>, vector<1x384x12xbf16>
    %16 = vector.shape_cast %15 : vector<1x384x12xbf16> to vector<384x12xbf16>
    %c1 = arith.constant 1 : index
    %c0_9 = arith.constant 0 : index
    %c0_10 = arith.constant 0 : index
    %17 = vector.load %arg4[%c1, %c0_9, %c0_10] : memref<3x12x128xbf16, #tpu.memory_space<vmem>>, vector<1x12x128xbf16>
    %18 = vector.shape_cast %17 : vector<1x12x128xbf16> to vector<12x128xbf16>
    %cst_11 = arith.constant dense<0.000000e+00> : vector<384x128xf32>
    %19 = tpu.matmul %16, %18, %cst_11 {dimension_numbers = #tpu.dot_dimension_numbers<[1], [0], [0], [1], [0, 0, 1, 1], [], []>} : vector<384x12xbf16>, vector<12x128xbf16>, vector<384x128xf32> -> vector<384x128xf32>
    %c0_12 = arith.constant 0 : index
    %c0_13 = arith.constant 0 : index
    %20 = vector.load %arg7[%c0_12, %c0_13] : memref<384x128xf32, #tpu.memory_space<vmem>>, vector<384x128xf32>
    %21 = arith.addf %20, %19 : vector<384x128xf32>
    %c0_14 = arith.constant 0 : index
    %c0_15 = arith.constant 0 : index
    %22 = vector.load %arg7[%c0_14, %c0_15] : memref<384x128xf32, #tpu.memory_space<vmem>>, vector<384x128xf32>
    tpu.vector_store %arg7[%c0_14, %c0_15], %21 {strides = array<i32>} : memref<384x128xf32, #tpu.memory_space<vmem>>, vector<384x128xf32>,
    %c1_i32_16 = arith.constant 1 : i32
    %23 = arith.muli %c1_i32_16, %0 : i32
    %c48_i32 = arith.constant 48 : i32
    %24 = arith.addi %23, %c48_i32 : i32
    %25 = tpu.assume_multiple %24, 8 : i32
    %c0_17 = arith.constant 0 : index
    %26 = arith.index_cast %25 : i32 to index
    %c0_18 = arith.constant 0 : index
    %27 = vector.load %arg3[%c0_17, %26, %c0_18] : memref<1x432x12xbf16, #tpu.memory_space<vmem>>, vector<1x384x12xbf16>
    %28 = vector.shape_cast %27 : vector<1x384x12xbf16> to vector<384x12xbf16>
    %c2 = arith.constant 2 : index
    %c0_19 = arith.constant 0 : index
    %c0_20 = arith.constant 0 : index
    %29 = vector.load %arg4[%c2, %c0_19, %c0_20] : memref<3x12x128xbf16, #tpu.memory_space<vmem>>, vector<1x12x128xbf16>
    %30 = vector.shape_cast %29 : vector<1x12x128xbf16> to vector<12x128xbf16>
    %cst_21 = arith.constant dense<0.000000e+00> : vector<384x128xf32>
    %31 = tpu.matmul %28, %30, %cst_21 {dimension_numbers = #tpu.dot_dimension_numbers<[1], [0], [0], [1], [0, 0, 1, 1], [], []>} : vector<384x12xbf16>, vector<12x128xbf16>, vector<384x128xf32> -> vector<384x128xf32>
    %c0_22 = arith.constant 0 : index
    %c0_23 = arith.constant 0 : index
    %32 = vector.load %arg7[%c0_22, %c0_23] : memref<384x128xf32, #tpu.memory_space<vmem>>, vector<384x128xf32>
    %33 = arith.addf %32, %31 : vector<384x128xf32>
    %c0_24 = arith.constant 0 : index
    %c0_25 = arith.constant 0 : index
    %34 = vector.load %arg7[%c0_24, %c0_25] : memref<384x128xf32, #tpu.memory_space<vmem>>, vector<384x128xf32>
    tpu.vector_store %arg7[%c0_24, %c0_25], %33 {strides = array<i32>} : memref<384x128xf32, #tpu.memory_space<vmem>>, vector<384x128xf32>,
    %c0_26 = arith.constant 0 : index
    %c0_27 = arith.constant 0 : index
    %35 = vector.load %arg7[%c0_26, %c0_27] : memref<384x128xf32, #tpu.memory_space<vmem>>, vector<384x128xf32>
    %c0_28 = arith.constant 0 : index
    %c0_29 = arith.constant 0 : index
    %36 = vector.load %arg5[%c0_28, %c0_29] : memref<1x128xf32, #tpu.memory_space<vmem>>, vector<1x128xf32>
    %37 = vector.broadcast %36 : vector<1x128xf32> to vector<384x128xf32>
    %38 = arith.addf %35, %37 : vector<384x128xf32>
    %cst_30 = arith.constant 0.000000e+00 : f32
    %39 = vector.broadcast %cst_30 : f32 to vector<384x128xf32>
    %40 = arith.maximumf %38, %39 : vector<384x128xf32>
    %41 = arith.truncf %40 : vector<384x128xf32> to vector<384x128xbf16>
    %c0_31 = arith.constant 0 : index
    %c0_32 = arith.constant 0 : index
    %c0_33 = arith.constant 0 : index
    %42 = vector.load %arg6[%c0_31, %c0_32, %c0_33] : memref<1x384x128xbf16, #tpu.memory_space<vmem>>, vector<1x384x128xbf16>
    %43 = vector.shape_cast %42 : vector<1x384x128xbf16> to vector<384x128xbf16>
    %44 = vector.shape_cast %41 : vector<384x128xbf16> to vector<1x384x128xbf16>
    tpu.vector_store %arg6[%c0_31, %c0_32, %c0_33], %44 {strides = array<i32>} : memref<1x384x128xbf16, #tpu.memory_space<vmem>>, vector<1x384x128xbf16>,
    return
  }
  func.func @transform_0(%arg0: i32, %arg1: i32, %arg2: i32) -> (i32, i32, i32) {
    %c0_i32 = arith.constant 0 : i32
    %c0_i32_0 = arith.constant 0 : i32
    %c0_i32_1 = arith.constant 0 : i32
    return %arg1, %c0_i32, %c0_i32_0 : i32, i32, i32
  }
  func.func @transform_1(%arg0: i32, %arg1: i32, %arg2: i32) -> (i32, i32, i32) {
    %c0_i32 = arith.constant 0 : i32
    %c0_i32_0 = arith.constant 0 : i32
    %c0_i32_1 = arith.constant 0 : i32
    return %c0_i32, %c0_i32_0, %arg0 : i32, i32, i32
  }
  func.func @transform_2(%arg0: i32, %arg1: i32, %arg2: i32) -> (i32, i32) {
    %c0_i32 = arith.constant 0 : i32
    %c0_i32_0 = arith.constant 0 : i32
    return %c0_i32, %arg0 : i32, i32
  }
  func.func @transform_3(%arg0: i32, %arg1: i32, %arg2: i32) -> (i32, i32, i32) {
    %c0_i32 = arith.constant 0 : i32
    return %arg1, %arg2, %arg0 : i32, i32, i32
  }
}

</mosaic_0001>

<bundles_post_ra>
// kernel: basic_conv2d.1
= control target key start
LH: loop header
LB: loop body
LE: loop exit
PB: predicated region body
PF: predicated region fallthrough
CT: control target
= control target key end

     0   :  { %s3509_s12 = smov 0   ;;  %s3511_s13 = smov 0   ;;  %s3826_s0 = inlined_call_operand.vmem [shape: bf16[2,432,12], index: 0, kind: input, shape index: {}]   ;;  %s3827_s1 = inlined_call_operand.vmem [shape: bf16[3,12,128], index: 1, kind: input, shape index: {}]   ;;  %s3828_s2 = inlined_call_operand.vmem [shape: f32[1,128], index: 2, kind: input, shape index: {}]   ;;  %s3829_s3 = inlined_call_operand.vmem [shape: bf16[2,384,128], index: 3, kind: output, shape index: {}]  }
   0x1   :  { %s3513_s14 = smov 0  }
   0x2 LB: > { %s28_s15 = sadd.s32 1, %s3483_s13  ;;  %p2545_p0 = scmp.ge.s32.totalorder %s3487_s14, 1  ;;  %s3487_s14 = sphi %s3513_s14, %s13_s14   ;;  %s3483_s13 = sphi %s3511_s13, %s3831_s13   ;;  %s3479_s12 = sphi %s3509_s12, %s3830_s12  }
   0x3   : > { %p30_p1 = scmp.ge.s32.totalorder %s28_s15, 2  ;;  %p177_p2 = scmp.lt.s32.totalorder %s3487_s14, 3 }
   0x5   : > { %s3833_s15 = smov (%p30_p1, %s28_s15), 0  ;;  %p178_p3 = pnand %p2545_p0, %p177_p2 }
   0x6   : > { %v3390_v0 = vld [vmem:[%s3827_s1] sm:$0x3f] (!%p178_p3)   ;;  %vm494_vm0 = vcmask (!%p178_p3), 1045504   ;;  %p215_p4 = scmp.lt.s32.totalorder (!%p178_p3), %s3479_s12, 1  ;;  %v3391_v1 = vld [vmem:[%s3827_s1 + $0x8] sm:$0x3f] (!%p178_p3)  }
   0x7   : > { %181 = sbr.rel (%p178_p3) target bundleno = 380 (0x17c), region = 32  ;;  %3360 = vmatprep.subr.msk.bf16.mxu1 (!%p178_p3), %vm494_vm0, %v3390_v0  ;;  %v496_v2 = vsel (!%p178_p3), %vm494_vm0, %v3390_v0, 0  ;;  %v3394_v3 = vld [vmem:[%s3827_s1 + $0x10] sm:$0x3f] (!%p178_p3)   ;;  %3361 = vmatprep.subr.msk.bf16.mxu0 (!%p178_p3), %vm494_vm0, %v3391_v1  ;;  %v1025_v4 = vsel (!%p178_p3), %vm494_vm0, %v3391_v1, 0  ;;  %vm421_vm1 = vcmask (!%p178_p3), 97280  }
   0x8   : > { %3113 = vmatpush3.bf16.msra.mxu1 (!%p178_p3), %v496_v2  ;;  %3163 = vmatpush3.bf16.msra.mxu0 (!%p178_p3), %v1025_v4  ;;  %v1650_v9 = vsel (!%p178_p3), %vm494_vm0, %v3394_v3, 0 }
   0x9   : > { %3362 = vmatprep.subr.msk.bf16.mxu1 (!%p178_p3), %vm494_vm0, %v3391_v1  ;;  %3363 = vmatprep.subr.msk.bf16.mxu0 (!%p178_p3), %vm494_vm0, %v3394_v3 }
   0xe   : > { %s3835_s12 = smov (!%p215_p4, %s3479_s12), 1 }
   0xf   : > { %s3364_s22 = smul.u32 216, %s3835_s12 }
  0x10   : > { %s3365_s28 = smul.u32 192, %s3835_s12 }
  0x11   : > { %s3548_s25 = scalar_lea.vmem %s3826_s0, %s3364_s22 }
  0x12   : > { %v3392_v5 = vld [vmem:[%s3548_s25] sm:$0xff]   ;;  %v3393_v6 = vld [vmem:[%s3548_s25 + $0xc] sm:$0xff]   ;;  %v3396_v8 = vld [vmem:[%s3548_s25 + $0x14] sm:$0xff]   ;;  %s3734_s4 = scalar_lea.vmem %s3829_s3, %s3365_s28 }
  0x13   : > { %3114 = vmatprep.mubr.msk.bf16.mxu1 %vm421_vm1, %v3392_v5  ;;  %v3395_v7 = vld [vmem:[%s3548_s25 + $0x8] sm:$0xff]   ;;  %3164 = vmatprep.mubr.msk.bf16.mxu0 %vm421_vm1, %v3393_v6  ;;  %v3397_v10 = vld [vmem:[%s3548_s25 + $0x10] sm:$0xff]   ;;  %v3398_v11 = vld [vmem:[%s3548_s25 + $0x1c] sm:$0xff]  }
  0x14   : > { %3115 = vmatmul.mubr.msk.bf16.vlgmr.msra.gmra.mrb[0].mxu1 %vm421_vm1, %v3395_v7  ;;  %3165 = vmatmul.mubr.msk.bf16.vlgmr.msra.gmra.mrb[0].mxu0 %vm421_vm1, %v3396_v8  ;;  %v3399_v12 = vld [vmem:[%s3548_s25 + $0x18] sm:$0xff]   ;;  %v3400_v13 = vld [vmem:[%s3548_s25 + $0x24] sm:$0xff]   ;;  %v3402_v15 = vld [vmem:[%s3548_s25 + $0x2c] sm:$0xff]  }
  0x15   : > { %3263 = vmatpush3.bf16.msra.mxu1 %v1025_v4  ;;  %3213 = vmatpush3.bf16.msra.mxu0 %v1650_v9  ;;  %v3401_v14 = vld [vmem:[%s3548_s25 + $0x20] sm:$0xff]   ;;  %v3403_v16 = vld [vmem:[%s3548_s25 + $0x28] sm:$0xff]   ;;  %v3404_v17 = vld [vmem:[%s3548_s25 + $0x34] sm:$0xff]  }
  0x16   : > { %3118 = vmatprep.mubr.msk.bf16.mxu1 %vm421_vm1, %v3397_v10  ;;  %3168 = vmatprep.mubr.msk.bf16.mxu0 %vm421_vm1, %v3398_v11  ;;  %v3405_v18 = vld [vmem:[%s3548_s25 + $0x30] sm:$0xff]   ;;  %v3406_v19 = vld [vmem:[%s3548_s25 + $0x3c] sm:$0xff]   ;;  %v3408_v21 = vld [vmem:[%s3548_s25 + $0x44] sm:$0xff]  }
  0x17   : > { %v3407_v20 = vld [vmem:[%s3548_s25 + $0x38] sm:$0xff]   ;;  %v3409_v22 = vld [vmem:[%s3548_s25 + $0x40] sm:$0xff]   ;;  %v3410_v23 = vld [vmem:[%s3548_s25 + $0x4c] sm:$0xff]  }
  0x18   : > { %v3411_v24 = vld [vmem:[%s3548_s25 + $0x48] sm:$0xff]   ;;  %v3412_v25 = vld [vmem:[%s3548_s25 + $0x54] sm:$0xff]   ;;  %v3414_v27 = vld [vmem:[%s3548_s25 + $0x5c] sm:$0xff]  }
  0x19   : > { %v3413_v26 = vld [vmem:[%s3548_s25 + $0x50] sm:$0xff]   ;;  %v3415_v28 = vld [vmem:[%s3548_s25 + $0x58] sm:$0xff]   ;;  %v3416_v29 = vld [vmem:[%s3548_s25 + $0x64] sm:$0xff]  }
  0x1a   : > { %v3417_v30 = vld [vmem:[%s3548_s25 + $0x60] sm:$0xff]   ;;  %v3418_v31 = vld [vmem:[%s3548_s25 + $0x18] sm:$0xff]   ;;  %v3419_v32 = vld [vmem:[%s3548_s25 + $0x68] sm:$0xff]  }
  0x1b   : > { %v3420_v33 = vld [vmem:[%s3548_s25 + $0x20] sm:$0xff]   ;;  %v3421_v34 = vld [vmem:[%s3548_s25 + $0x70] sm:$0xff]   ;;  %v3422_v35 = vld [vmem:[%s3548_s25 + $0x28] sm:$0xff]  }
  0x1c   : > { %3119 = vmatmul.mubr.msk.bf16.gmra.mrb[4].mxu1 %vm421_vm1, %v3399_v12  ;;  %3169 = vmatmul.mubr.msk.bf16.gmra.mrb[4].mxu0 %vm421_vm1, %v3400_v13  ;;  %v3423_v36 = vld [vmem:[%s3548_s25 + $0x78] sm:$0xff]   ;;  %v3424_v37 = vld [vmem:[%s3548_s25 + $0x30] sm:$0xff]   ;;  %v3425_v38 = vld [vmem:[%s3548_s25 + $0x80] sm:$0xff]  }
  0x1d   : > { %3122 = vmatprep.mubr.msk.bf16.mxu1 %vm421_vm1, %v3401_v14  ;;  %3172 = vmatprep.mubr.msk.bf16.mxu0 %vm421_vm1, %v3402_v15  ;;  %v3426_v39 = vld [vmem:[%s3548_s25 + $0x38] sm:$0xff]   ;;  %v3427_v40 = vld [vmem:[%s3548_s25 + $0x88] sm:$0xff]   ;;  %v3428_v41 = vld [vmem:[%s3548_s25 + $0x40] sm:$0xff]  }
  0x1e   : > { %v3429_v42 = vld [vmem:[%s3548_s25 + $0x90] sm:$0xff]   ;;  %v3430_v43 = vld [vmem:[%s3548_s25 + $0x48] sm:$0xff]   ;;  %v3431_v44 = vld [vmem:[%s3548_s25 + $0x98] sm:$0xff]  }
  0x1f   : > { %v3432_v45 = vld [vmem:[%s3548_s25 + $0x50] sm:$0xff]   ;;  %v3433_v46 = vld [vmem:[%s3548_s25 + $0xa0] sm:$0xff]   ;;  %v3434_v47 = vld [vmem:[%s3548_s25 + $0x58] sm:$0xff]  }
  0x20   : > { %v3435_v48 = vld [vmem:[%s3548_s25 + $0xa8] sm:$0xff]   ;;  %v3436_v49 = vld [vmem:[%s3548_s25 + $0x60] sm:$0xff]   ;;  %v3437_v50 = vld [vmem:[%s3548_s25 + $0xb0] sm:$0xff]  }
  0x21   : > { %v3438_v51 = vld [vmem:[%s3548_s25 + $0x68] sm:$0xff]   ;;  %v3439_v52 = vld [vmem:[%s3548_s25 + $0xb8] sm:$0xff]   ;;  %v3440_v53 = vld [vmem:[%s3548_s25 + $0x70] sm:$0xff]  }
  0x22   : > { %v3441_v54 = vld [vmem:[%s3548_s25 + $0x6c] sm:$0xff]   ;;  %v3442_v55 = vld [vmem:[%s3548_s25 + $0x78] sm:$0xff]   ;;  %v3444_v57 = vld [vmem:[%s3548_s25 + $0x80] sm:$0xff]  }
  0x23   : > { %v3443_v56 = vld [vmem:[%s3548_s25 + $0x74] sm:$0xff]   ;;  %v3445_v58 = vld [vmem:[%s3548_s25 + $0x7c] sm:$0xff]   ;;  %v3446_v59 = vld [vmem:[%s3548_s25 + $0x88] sm:$0xff]  }
  0x24   : > { %3123 = vmatmul.mubr.msk.bf16.gmra.mrb[8].mxu1 %vm421_vm1, %v3403_v16  ;;  %3173 = vmatmul.mubr.msk.bf16.gmra.mrb[8].mxu0 %vm421_vm1, %v3404_v17  ;;  %v3447_v60 = vld [vmem:[%s3548_s25 + $0x84] sm:$0xff]   ;;  %v3448_v61 = vld [vmem:[%s3548_s25 + $0x90] sm:$0xff]   ;;  %v3450_v63 = vld [vmem:[%s3548_s25 + $0x98] sm:$0xff]  }
  0x25   : > { %3126 = vmatprep.mubr.msk.bf16.mxu1 %vm421_vm1, %v3405_v18  ;;  %3176 = vmatprep.mubr.msk.bf16.mxu0 %vm421_vm1, %v3406_v19  ;;  %v3449_v62 = vld [vmem:[%s3548_s25 + $0x8c] sm:$0xff]   ;;  %v3451_v0 = vld [vmem:[%s3548_s25 + $0x94] sm:$0xff]   ;;  %v3452_v1 = vld [vmem:[%s3548_s25 + $0xa0] sm:$0xff]  }
  0x26   : > { %v3453_v2 = vld [vmem:[%s3548_s25 + $0x9c] sm:$0xff]   ;;  %v3454_v3 = vld [vmem:[%s3548_s25 + $0xa8] sm:$0xff]   ;;  %v3456_v5 = vld [vmem:[%s3548_s25 + $0xb0] sm:$0xff]  }
  0x27   : > { %v3455_v4 = vld [vmem:[%s3548_s25 + $0xa4] sm:$0xff]   ;;  %v3457_v6 = vld [vmem:[%s3548_s25 + $0xac] sm:$0xff]   ;;  %v3458_v7 = vld [vmem:[%s3548_s25 + $0xb8] sm:$0xff]  }
  0x28   : > { %v3459_v8 = vld [vmem:[%s3548_s25 + $0xb4] sm:$0xff]   ;;  %v3460_v9 = vld [vmem:[%s3548_s25 + $0xc0] sm:$0xff]   ;;  %v3462_v11 = vld [vmem:[%s3548_s25 + $0xc8] sm:$0xff]  }
  0x29   : > { %v3461_v10 = vld [vmem:[%s3548_s25 + $0xbc] sm:$0xff]   ;;  %v3463_v12 = vld [vmem:[%s3548_s25 + $0xc4] sm:$0xff]   ;;  %v3464_v13 = vld [vmem:[%s3548_s25 + $0xd0] sm:$0xff]  }
  0x2c   : > { %3127 = vmatmul.mubr.msk.bf16.gmra.mrb[12].mxu1 %vm421_vm1, %v3407_v20  ;;  %3177 = vmatmul.mubr.msk.bf16.gmra.mrb[12].mxu0 %vm421_vm1, %v3408_v21 }
  0x2d   : > { %3130 = vmatprep.mubr.msk.bf16.mxu1 %vm421_vm1, %v3409_v22  ;;  %3180 = vmatprep.mubr.msk.bf16.mxu0 %vm421_vm1, %v3410_v23 }
  0x34   : > { %3131 = vmatmul.mubr.msk.bf16.gmra.mrb[16].mxu1 %vm421_vm1, %v3411_v24  ;;  %3181 = vmatmul.mubr.msk.bf16.gmra.mrb[16].mxu0 %vm421_vm1, %v3412_v25 }
  0x35   : > { %3134 = vmatprep.mubr.msk.bf16.mxu1 %vm421_vm1, %v3413_v26  ;;  %3184 = vmatprep.mubr.msk.bf16.mxu0 %vm421_vm1, %v3414_v27 }
  0x3c   : > { %3135 = vmatmul.mubr.msk.bf16.gmra.mrb[20].mxu1 %vm421_vm1, %v3415_v28  ;;  %3185 = vmatmul.mubr.msk.bf16.gmra.mrb[20].mxu0 %vm421_vm1, %v3416_v29 }
  0x3d   : > { %3138 = vmatprep.mubr.msk.bf16.mxu1 %vm421_vm1, %v3417_v30  ;;  %3214 = vmatprep.mubr.msk.bf16.mxu0 %vm421_vm1, %v3418_v31 }
  0x44   : > { %3139 = vmatmul.mubr.msk.bf16.gmra.mrb[24].mxu1 %vm421_vm1, %v3419_v32  ;;  %3215 = vmatmul.mubr.msk.bf16.vlgmr.msra.gmra.mrb[0].mxu0 %vm421_vm1, %v3420_v33 }
  0x45   : > { %3142 = vmatprep.mubr.msk.bf16.mxu1 %vm421_vm1, %v3421_v34  ;;  %3218 = vmatprep.mubr.msk.bf16.mxu0 %vm421_vm1, %v3422_v35 }
  0x4c   : > { %3143 = vmatmul.mubr.msk.bf16.gmra.mrb[28].mxu1 %vm421_vm1, %v3423_v36  ;;  %3219 = vmatmul.mubr.msk.bf16.gmra.mrb[4].mxu0 %vm421_vm1, %v3424_v37 }
  0x4d   : > { %3146 = vmatprep.mubr.msk.bf16.mxu1 %vm421_vm1, %v3425_v38  ;;  %3222 = vmatprep.mubr.msk.bf16.mxu0 %vm421_vm1, %v3426_v39  ;;  %v3724_v39 = vld [vmem:[%s3828_s2] ss:$0 sm:$0xff] }
  0x54   : > { %3147 = vmatmul.mubr.msk.bf16.gmra.mrb[32].mxu1 %vm421_vm1, %v3427_v40  ;;  %3223 = vmatmul.mubr.msk.bf16.gmra.mrb[8].mxu0 %vm421_vm1, %v3428_v41 }
  0x55   : > { %3150 = vmatprep.mubr.msk.bf16.mxu1 %vm421_vm1, %v3429_v42  ;;  %3226 = vmatprep.mubr.msk.bf16.mxu0 %vm421_vm1, %v3430_v43 }
  0x5c   : > { %3151 = vmatmul.mubr.msk.bf16.gmra.mrb[36].mxu1 %vm421_vm1, %v3431_v44  ;;  %3227 = vmatmul.mubr.msk.bf16.gmra.mrb[12].mxu0 %vm421_vm1, %v3432_v45 }
  0x5d   : > { %3154 = vmatprep.mubr.msk.bf16.mxu1 %vm421_vm1, %v3433_v46  ;;  %3230 = vmatprep.mubr.msk.bf16.mxu0 %vm421_vm1, %v3434_v47 }
  0x64   : > { %3155 = vmatmul.mubr.msk.bf16.gmra.mrb[40].mxu1 %vm421_vm1, %v3435_v48  ;;  %3231 = vmatmul.mubr.msk.bf16.gmra.mrb[16].mxu0 %vm421_vm1, %v3436_v49 }
  0x65   : > { %3158 = vmatprep.mubr.msk.bf16.mxu1 %vm421_vm1, %v3437_v50  ;;  %3234 = vmatprep.mubr.msk.bf16.mxu0 %vm421_vm1, %v3438_v51 }
  0x6c   : > { %3159 = vmatmul.mubr.msk.bf16.gmra.mrb[44].mxu1 %vm421_vm1, %v3439_v52  ;;  %3235 = vmatmul.mubr.msk.bf16.gmra.mrb[20].mxu0 %vm421_vm1, %v3440_v53 }
  0x6d   : > { %3188 = vmatprep.mubr.msk.bf16.mxu1 %vm421_vm1, %v3441_v54  ;;  %3238 = vmatprep.mubr.msk.bf16.mxu0 %vm421_vm1, %v3442_v55 }
  0x74   : > { %3189 = vmatmul.mubr.msk.bf16.vlgmr.msra.gmra.mrb[24].mxu1 %vm421_vm1, %v3443_v56  ;;  %3239 = vmatmul.mubr.msk.bf16.gmra.mrb[24].mxu0 %vm421_vm1, %v3444_v57 }
  0x75   : > { %3192 = vmatprep.mubr.msk.bf16.mxu1 %vm421_vm1, %v3445_v58  ;;  %3242 = vmatprep.mubr.msk.bf16.mxu0 %vm421_vm1, %v3446_v59 }
  0x7c   : > { %3193 = vmatmul.mubr.msk.bf16.gmra.mrb[28].mxu1 %vm421_vm1, %v3447_v60  ;;  %3243 = vmatmul.mubr.msk.bf16.gmra.mrb[28].mxu0 %vm421_vm1, %v3448_v61 }
  0x7d   : > { %3196 = vmatprep.mubr.msk.bf16.mxu1 %vm421_vm1, %v3449_v62  ;;  %3246 = vmatprep.mubr.msk.bf16.mxu0 %vm421_vm1, %v3450_v63 }
  0x84   : > { %3197 = vmatmul.mubr.msk.bf16.gmra.mrb[32].mxu1 %vm421_vm1, %v3451_v0  ;;  %3247 = vmatmul.mubr.msk.bf16.gmra.mrb[32].mxu0 %vm421_vm1, %v3452_v1 }
  0x85   : > { %3200 = vmatprep.mubr.msk.bf16.mxu1 %vm421_vm1, %v3453_v2  ;;  %3250 = vmatprep.mubr.msk.bf16.mxu0 %vm421_vm1, %v3454_v3 }
  0x8c   : > { %3201 = vmatmul.mubr.msk.bf16.gmra.mrb[36].mxu1 %vm421_vm1, %v3455_v4  ;;  %3251 = vmatmul.mubr.msk.bf16.gmra.mrb[36].mxu0 %vm421_vm1, %v3456_v5 }
  0x8d   : > { %3204 = vmatprep.mubr.msk.bf16.mxu1 %vm421_vm1, %v3457_v6  ;;  %3254 = vmatprep.mubr.msk.bf16.mxu0 %vm421_vm1, %v3458_v7 }
  0x94   : > { %3205 = vmatmul.mubr.msk.bf16.gmra.mrb[40].mxu1 %vm421_vm1, %v3459_v8  ;;  %3255 = vmatmul.mubr.msk.bf16.gmra.mrb[40].mxu0 %vm421_vm1, %v3460_v9 }
  0x95   : > { %3208 = vmatprep.mubr.msk.bf16.mxu1 %vm421_vm1, %v3461_v10  ;;  %3258 = vmatprep.mubr.msk.bf16.mxu0 %vm421_vm1, %v3462_v11 }
  0x9c   : > { %3209 = vmatmul.mubr.msk.bf16.gmra.mrb[44].mxu1 %vm421_vm1, %v3463_v12  ;;  %3259 = vmatmul.mubr.msk.bf16.gmra.mrb[44].mxu0 %vm421_vm1, %v3464_v13 }
  0xe7   : > { %v3116_v14 = vpop.f32.mrb[0].mxu1 }
  0xe8   : > { %v532_v15 = vpop.f32.mrb[1].mxu1 }
  0xe9   : > { %v3117_v16 = vpop.f32.mrb[2].mxu1 }
  0xea   : > { %v535_v17 = vpop.f32.mrb[3].mxu1 }
  0xef   : > { %v3120_v18 = vpop.f32.mrb[4].mxu1 }
  0xf0   : > { %v548_v19 = vpop.f32.mrb[5].mxu1 }
  0xf1   : > { %v3121_v20 = vpop.f32.mrb[6].mxu1 }
  0xf2   : > { %v551_v21 = vpop.f32.mrb[7].mxu1 }
  0xf7   : > { %v3124_v22 = vpop.f32.mrb[8].mxu1 }
  0xf8   : > { %v564_v23 = vpop.f32.mrb[9].mxu1 }
  0xf9   : > { %v3125_v24 = vpop.f32.mrb[10].mxu1 }
  0xfa   : > { %v3695_v25 = vpop.f32.mrb[11].mxu1 }
  0xff   : > { %v3697_v26 = vpop.f32.mrb[12].mxu1 }
 0x100   : > { %v3699_v27 = vpop.f32.mrb[13].mxu1 }
 0x101   : > { %v3701_v28 = vpop.f32.mrb[14].mxu1 }
 0x102   : > { %v3703_v29 = vpop.f32.mrb[15].mxu1 }
 0x107   : > { %v3705_v30 = vpop.f32.mrb[16].mxu1 }
 0x108   : > { %v3707_v31 = vpop.f32.mrb[17].mxu1 }
 0x109   : > { %v3709_v32 = vpop.f32.mrb[18].mxu1 }
 0x10a   : > { %v3711_v33 = vpop.f32.mrb[19].mxu1 }
 0x10f   : > { %v3713_v34 = vpop.f32.mrb[20].mxu1 }
 0x110   : > { %v3715_v35 = vpop.f32.mrb[21].mxu1 }
 0x111   : > { %v3717_v36 = vpop.f32.mrb[22].mxu1 }
 0x112   : > { %v3719_v37 = vpop.f32.mrb[23].mxu1 }
 0x117   : > { %v3216_v38 = vpop.f32.mrb[0].mxu0 }
 0x118   : > { %v3264_v40 = vadd.f32 %v3216_v38, %v3116_v14  ;;  %v1686_v41 = vpop.f32.mrb[1].mxu0 }
 0x119   : > { %v3265_v42 = vadd.f32 %v1686_v41, %v532_v15  ;;  %v3217_v43 = vpop.f32.mrb[2].mxu0 }
 0x11a   : > { %v2078_v44 = vadd.f32 %v3264_v40, %v3724_v39  ;;  %v3266_v45 = vadd.f32 %v3217_v43, %v3117_v16  ;;  %v1689_v46 = vpop.f32.mrb[3].mxu0 }
 0x11b   : > { %v2076_v47 = vadd.f32 %v3265_v42, %v3724_v39  ;;  %v3267_v48 = vadd.f32 %v1689_v46, %v535_v17 }
 0x11c   : > { %v2079_v49 = vadd.f32 %v3266_v45, %v3724_v39  ;;  %v2126_v51 = vmax.f32 %v2078_v44, 0.0 }
 0x11d   : > { %v2077_v50 = vadd.f32 %v3267_v48, %v3724_v39  ;;  %v2124_v53 = vmax.f32 %v2076_v47, 0.0 }
 0x11e   : > { %v2127_v52 = vmax.f32 %v2079_v49, 0.0 }
 0x11f   : > { %v2125_v54 = vmax.f32 %v2077_v50, 0.0  ;;  %v3220_v55 = vpop.f32.mrb[4].mxu0 }
 0x120   : > { %v2902_v56 = vpack.c.bf16 %v2127_v52, %v2126_v51  ;;  %v3268_v57 = vadd.f32 %v3220_v55, %v3120_v18  ;;  %v1702_v58 = vpop.f32.mrb[5].mxu0 }
 0x121   : > { %v2897_v59 = vpack.c.bf16 %v2125_v54, %v2124_v53  ;;  %v3269_v60 = vadd.f32 %v1702_v58, %v548_v19  ;;  %v3221_v61 = vpop.f32.mrb[6].mxu0 }
 0x122   : > { %3014 = vst [vmem:[%s3734_s4 + $0x8] sm:$0xff] %v2902_v56   ;;  %v2082_v62 = vadd.f32 %v3268_v57, %v3724_v39  ;;  %v3270_v63 = vadd.f32 %v3221_v61, %v3121_v20  ;;  %v1705_v0 = vpop.f32.mrb[7].mxu0 }
 0x123   : > { %2898 = vst [vmem:[%s3734_s4] sm:$0xff] %v2897_v59   ;;  %v2080_v1 = vadd.f32 %v3269_v60, %v3724_v39  ;;  %v3271_v2 = vadd.f32 %v1705_v0, %v551_v21 }
 0x124   : > { %v2083_v3 = vadd.f32 %v3270_v63, %v3724_v39  ;;  %v2130_v5 = vmax.f32 %v2082_v62, 0.0 }
 0x125   : > { %v2081_v4 = vadd.f32 %v3271_v2, %v3724_v39  ;;  %v2128_v7 = vmax.f32 %v2080_v1, 0.0 }
 0x126   : > { %v2131_v6 = vmax.f32 %v2083_v3, 0.0 }
 0x127   : > { %v2129_v8 = vmax.f32 %v2081_v4, 0.0  ;;  %v3224_v9 = vpop.f32.mrb[8].mxu0 }
 0x128   : > { %v2912_v10 = vpack.c.bf16 %v2131_v6, %v2130_v5  ;;  %v3272_v11 = vadd.f32 %v3224_v9, %v3124_v22  ;;  %v1718_v12 = vpop.f32.mrb[9].mxu0 }
 0x129   : > { %v2907_v13 = vpack.c.bf16 %v2129_v8, %v2128_v7  ;;  %v3273_v14 = vadd.f32 %v1718_v12, %v564_v23  ;;  %v3225_v15 = vpop.f32.mrb[10].mxu0 }
 0x12a   : > { %3016 = vst [vmem:[%s3734_s4 + $0x18] sm:$0xff] %v2912_v10   ;;  %v2086_v16 = vadd.f32 %v3272_v11, %v3724_v39  ;;  %v3274_v17 = vadd.f32 %v3225_v15, %v3125_v24  ;;  %v1721_v18 = vpop.f32.mrb[11].mxu0 }
 0x12b   : > { %3015 = vst [vmem:[%s3734_s4 + $0x10] sm:$0xff] %v2907_v13   ;;  %v2084_v19 = vadd.f32 %v3273_v14, %v3724_v39  ;;  %v3275_v20 = vadd.f32 %v1721_v18, %v3695_v25 }
 0x12c   : > { %v2087_v21 = vadd.f32 %v3274_v17, %v3724_v39  ;;  %v2134_v22 = vmax.f32 %v2086_v16, 0.0 }
 0x12d   : > { %v2085_v38 = vadd.f32 %v3275_v20, %v3724_v39  ;;  %v2132_v23 = vmax.f32 %v2084_v19, 0.0 }
 0x12e   : > { %v2135_v40 = vmax.f32 %v2087_v21, 0.0 }
 0x12f   : > { %v2133_v41 = vmax.f32 %v2085_v38, 0.0  ;;  %v3228_v42 = vpop.f32.mrb[12].mxu0 }
 0x130   : > { %v2922_v43 = vpack.c.bf16 %v2135_v40, %v2134_v22  ;;  %v3276_v24 = vadd.f32 %v3228_v42, %v3697_v26  ;;  %v1734_v44 = vpop.f32.mrb[13].mxu0 }
 0x131   : > { %v2917_v45 = vpack.c.bf16 %v2133_v41, %v2132_v23  ;;  %v3277_v46 = vadd.f32 %v1734_v44, %v3699_v27  ;;  %v3229_v47 = vpop.f32.mrb[14].mxu0 }
 0x132   : > { %3018 = vst [vmem:[%s3734_s4 + $0x28] sm:$0xff] %v2922_v43   ;;  %v2090_v25 = vadd.f32 %v3276_v24, %v3724_v39  ;;  %v3278_v48 = vadd.f32 %v3229_v47, %v3701_v28  ;;  %v1737_v49 = vpop.f32.mrb[15].mxu0 }
 0x133   : > { %3017 = vst [vmem:[%s3734_s4 + $0x20] sm:$0xff] %v2917_v45   ;;  %v2088_v50 = vadd.f32 %v3277_v46, %v3724_v39  ;;  %v3279_v51 = vadd.f32 %v1737_v49, %v3703_v29 }
 0x134   : > { %v2091_v52 = vadd.f32 %v3278_v48, %v3724_v39  ;;  %v2138_v53 = vmax.f32 %v2090_v25, 0.0 }
 0x135   : > { %v2089_v26 = vadd.f32 %v3279_v51, %v3724_v39  ;;  %v2136_v54 = vmax.f32 %v2088_v50, 0.0 }
 0x136   : > { %v2139_v27 = vmax.f32 %v2091_v52, 0.0 }
 0x137   : > { %v2137_v55 = vmax.f32 %v2089_v26, 0.0  ;;  %v3232_v56 = vpop.f32.mrb[16].mxu0 }
 0x138   : > { %v2932_v57 = vpack.c.bf16 %v2139_v27, %v2138_v53  ;;  %v3280_v28 = vadd.f32 %v3232_v56, %v3705_v30  ;;  %v1750_v58 = vpop.f32.mrb[17].mxu0 }
 0x139   : > { %v2927_v59 = vpack.c.bf16 %v2137_v55, %v2136_v54  ;;  %v3281_v60 = vadd.f32 %v1750_v58, %v3707_v31  ;;  %v3233_v61 = vpop.f32.mrb[18].mxu0 }
 0x13a   : > { %3020 = vst [vmem:[%s3734_s4 + $0x38] sm:$0xff] %v2932_v57   ;;  %v2094_v29 = vadd.f32 %v3280_v28, %v3724_v39  ;;  %v3282_v62 = vadd.f32 %v3233_v61, %v3709_v32  ;;  %v1753_v63 = vpop.f32.mrb[19].mxu0 }
 0x13b   : > { %3019 = vst [vmem:[%s3734_s4 + $0x30] sm:$0xff] %v2927_v59   ;;  %v2092_v0 = vadd.f32 %v3281_v60, %v3724_v39  ;;  %v3283_v1 = vadd.f32 %v1753_v63, %v3711_v33 }
 0x13c   : > { %v2095_v2 = vadd.f32 %v3282_v62, %v3724_v39  ;;  %v2142_v3 = vmax.f32 %v2094_v29, 0.0 }
 0x13d   : > { %v2093_v30 = vadd.f32 %v3283_v1, %v3724_v39  ;;  %v2140_v4 = vmax.f32 %v2092_v0, 0.0 }
 0x13e   : > { %v2143_v31 = vmax.f32 %v2095_v2, 0.0 }
 0x13f   : > { %v2141_v5 = vmax.f32 %v2093_v30, 0.0  ;;  %v3236_v6 = vpop.f32.mrb[20].mxu0 }
 0x140   : > { %v2942_v7 = vpack.c.bf16 %v2143_v31, %v2142_v3  ;;  %v3284_v32 = vadd.f32 %v3236_v6, %v3713_v34  ;;  %v1766_v8 = vpop.f32.mrb[21].mxu0 }
 0x141   : > { %v2937_v9 = vpack.c.bf16 %v2141_v5, %v2140_v4  ;;  %v3285_v10 = vadd.f32 %v1766_v8, %v3715_v35  ;;  %v3237_v11 = vpop.f32.mrb[22].mxu0 }
 0x142   : > { %3022 = vst [vmem:[%s3734_s4 + $0x48] sm:$0xff] %v2942_v7   ;;  %v2098_v33 = vadd.f32 %v3284_v32, %v3724_v39  ;;  %v3286_v12 = vadd.f32 %v3237_v11, %v3717_v36  ;;  %v1769_v13 = vpop.f32.mrb[23].mxu0 }
 0x143   : > { %3021 = vst [vmem:[%s3734_s4 + $0x40] sm:$0xff] %v2937_v9   ;;  %v2096_v14 = vadd.f32 %v3285_v10, %v3724_v39  ;;  %v3287_v15 = vadd.f32 %v1769_v13, %v3719_v37 }
 0x144   : > { %v2099_v16 = vadd.f32 %v3286_v12, %v3724_v39  ;;  %v2146_v17 = vmax.f32 %v2098_v33, 0.0 }
 0x145   : > { %v2097_v34 = vadd.f32 %v3287_v15, %v3724_v39  ;;  %v2144_v19 = vmax.f32 %v2096_v14, 0.0 }
 0x146   : > { %v2147_v18 = vmax.f32 %v2099_v16, 0.0 }
 0x147   : > { %v3190_v35 = vpop.f32.mrb[24].mxu1  ;;  %v2145_v20 = vmax.f32 %v2097_v34, 0.0  ;;  %v3240_v21 = vpop.f32.mrb[24].mxu0 }
 0x148   : > { %v1157_v38 = vpop.f32.mrb[25].mxu1  ;;  %v2952_v36 = vpack.c.bf16 %v2147_v18, %v2146_v17  ;;  %v3288_v22 = vadd.f32 %v3240_v21, %v3190_v35  ;;  %v1782_v40 = vpop.f32.mrb[25].mxu0 }
 0x149   : > { %v3191_v23 = vpop.f32.mrb[26].mxu1  ;;  %v2947_v41 = vpack.c.bf16 %v2145_v20, %v2144_v19  ;;  %v3289_v42 = vadd.f32 %v1782_v40, %v1157_v38  ;;  %v3241_v37 = vpop.f32.mrb[26].mxu0 }
 0x14a   : > { %v1160_v43 = vpop.f32.mrb[27].mxu1  ;;  %3024 = vst [vmem:[%s3734_s4 + $0x58] sm:$0xff] %v2952_v36   ;;  %v2102_v24 = vadd.f32 %v3288_v22, %v3724_v39  ;;  %v3290_v44 = vadd.f32 %v3241_v37, %v3191_v23  ;;  %v1785_v45 = vpop.f32.mrb[27].mxu0 }
 0x14b   : > { %3023 = vst [vmem:[%s3734_s4 + $0x50] sm:$0xff] %v2947_v41   ;;  %v2100_v46 = vadd.f32 %v3289_v42, %v3724_v39  ;;  %v3291_v47 = vadd.f32 %v1785_v45, %v1160_v43 }
 0x14c   : > { %v2103_v25 = vadd.f32 %v3290_v44, %v3724_v39  ;;  %v2150_v49 = vmax.f32 %v2102_v24, 0.0 }
 0x14d   : > { %v2101_v48 = vadd.f32 %v3291_v47, %v3724_v39  ;;  %v2148_v52 = vmax.f32 %v2100_v46, 0.0 }
 0x14e   : > { %v2151_v50 = vmax.f32 %v2103_v25, 0.0 }
 0x14f   : > { %v3194_v51 = vpop.f32.mrb[28].mxu1  ;;  %v2149_v26 = vmax.f32 %v2101_v48, 0.0  ;;  %v3244_v53 = vpop.f32.mrb[28].mxu0 }
 0x150   : > { %v1173_v27 = vpop.f32.mrb[29].mxu1  ;;  %v2962_v54 = vpack.c.bf16 %v2151_v50, %v2150_v49  ;;  %v3292_v55 = vadd.f32 %v3244_v53, %v3194_v51  ;;  %v1798_v56 = vpop.f32.mrb[29].mxu0 }
 0x151   : > { %v3195_v57 = vpop.f32.mrb[30].mxu1  ;;  %v2957_v28 = vpack.c.bf16 %v2149_v26, %v2148_v52  ;;  %v3293_v58 = vadd.f32 %v1798_v56, %v1173_v27  ;;  %v3245_v59 = vpop.f32.mrb[30].mxu0 }
 0x152   : > { %v1176_v60 = vpop.f32.mrb[31].mxu1  ;;  %3026 = vst [vmem:[%s3734_s4 + $0x68] sm:$0xff] %v2962_v54   ;;  %v2106_v61 = vadd.f32 %v3292_v55, %v3724_v39  ;;  %v3294_v29 = vadd.f32 %v3245_v59, %v3195_v57  ;;  %v1801_v62 = vpop.f32.mrb[31].mxu0 }
 0x153   : > { %3025 = vst [vmem:[%s3734_s4 + $0x60] sm:$0xff] %v2957_v28   ;;  %v2104_v63 = vadd.f32 %v3293_v58, %v3724_v39  ;;  %v3295_v0 = vadd.f32 %v1801_v62, %v1176_v60 }
 0x154   : > { %v2107_v1 = vadd.f32 %v3294_v29, %v3724_v39  ;;  %v2154_v30 = vmax.f32 %v2106_v61, 0.0 }
 0x155   : > { %v2105_v2 = vadd.f32 %v3295_v0, %v3724_v39  ;;  %v2152_v4 = vmax.f32 %v2104_v63, 0.0 }
 0x156   : > { %v2155_v3 = vmax.f32 %v2107_v1, 0.0 }
 0x157   : > { %v3198_v31 = vpop.f32.mrb[32].mxu1  ;;  %v2153_v5 = vmax.f32 %v2105_v2, 0.0  ;;  %v3248_v6 = vpop.f32.mrb[32].mxu0 }
 0x158   : > { %v1189_v7 = vpop.f32.mrb[33].mxu1  ;;  %v2972_v32 = vpack.c.bf16 %v2155_v3, %v2154_v30  ;;  %v3296_v8 = vadd.f32 %v3248_v6, %v3198_v31  ;;  %v1814_v9 = vpop.f32.mrb[33].mxu0 }
 0x159   : > { %v3199_v10 = vpop.f32.mrb[34].mxu1  ;;  %v2967_v11 = vpack.c.bf16 %v2153_v5, %v2152_v4  ;;  %v3297_v33 = vadd.f32 %v1814_v9, %v1189_v7  ;;  %v3249_v12 = vpop.f32.mrb[34].mxu0 }
 0x15a   : > { %v1192_v13 = vpop.f32.mrb[35].mxu1  ;;  %3028 = vst [vmem:[%s3734_s4 + $0x78] sm:$0xff] %v2972_v32   ;;  %v2110_v14 = vadd.f32 %v3296_v8, %v3724_v39  ;;  %v3298_v15 = vadd.f32 %v3249_v12, %v3199_v10  ;;  %v1817_v16 = vpop.f32.mrb[35].mxu0 }
 0x15b   : > { %3027 = vst [vmem:[%s3734_s4 + $0x70] sm:$0xff] %v2967_v11   ;;  %v2108_v34 = vadd.f32 %v3297_v33, %v3724_v39  ;;  %v3299_v17 = vadd.f32 %v1817_v16, %v1192_v13 }
 0x15c   : > { %v2111_v18 = vadd.f32 %v3298_v15, %v3724_v39  ;;  %v2158_v19 = vmax.f32 %v2110_v14, 0.0 }
 0x15d   : > { %v2109_v35 = vadd.f32 %v3299_v17, %v3724_v39  ;;  %v2156_v38 = vmax.f32 %v2108_v34, 0.0 }
 0x15e   : > { %v2159_v20 = vmax.f32 %v2111_v18, 0.0 }
 0x15f   : > { %v3202_v21 = vpop.f32.mrb[36].mxu1  ;;  %v2157_v36 = vmax.f32 %v2109_v35, 0.0  ;;  %v3252_v22 = vpop.f32.mrb[36].mxu0 }
 0x160   : > { %v1205_v40 = vpop.f32.mrb[37].mxu1  ;;  %v2982_v23 = vpack.c.bf16 %v2159_v20, %v2158_v19  ;;  %v3300_v41 = vadd.f32 %v3252_v22, %v3202_v21  ;;  %v1830_v42 = vpop.f32.mrb[37].mxu0 }
 0x161   : > { %v3203_v37 = vpop.f32.mrb[38].mxu1  ;;  %v2977_v43 = vpack.c.bf16 %v2157_v36, %v2156_v38  ;;  %v3301_v24 = vadd.f32 %v1830_v42, %v1205_v40  ;;  %v3253_v44 = vpop.f32.mrb[38].mxu0 }
 0x162   : > { %v1208_v45 = vpop.f32.mrb[39].mxu1  ;;  %3030 = vst [vmem:[%s3734_s4 + $0x88] sm:$0xff] %v2982_v23   ;;  %v2114_v46 = vadd.f32 %v3300_v41, %v3724_v39  ;;  %v3302_v47 = vadd.f32 %v3253_v44, %v3203_v37  ;;  %v1833_v25 = vpop.f32.mrb[39].mxu0 }
 0x163   : > { %3029 = vst [vmem:[%s3734_s4 + $0x80] sm:$0xff] %v2977_v43   ;;  %v2112_v48 = vadd.f32 %v3301_v24, %v3724_v39  ;;  %v3303_v49 = vadd.f32 %v1833_v25, %v1208_v45 }
 0x164   : > { %v2115_v50 = vadd.f32 %v3302_v47, %v3724_v39  ;;  %v2162_v52 = vmax.f32 %v2114_v46, 0.0 }
 0x165   : > { %v2113_v51 = vadd.f32 %v3303_v49, %v3724_v39  ;;  %v2160_v27 = vmax.f32 %v2112_v48, 0.0 }
 0x166   : > { %v2163_v26 = vmax.f32 %v2115_v50, 0.0 }
 0x167   : > { %v3206_v53 = vpop.f32.mrb[40].mxu1  ;;  %v2161_v54 = vmax.f32 %v2113_v51, 0.0  ;;  %v3256_v55 = vpop.f32.mrb[40].mxu0 }
 0x168   : > { %v1221_v56 = vpop.f32.mrb[41].mxu1  ;;  %v2992_v57 = vpack.c.bf16 %v2163_v26, %v2162_v52  ;;  %v3304_v28 = vadd.f32 %v3256_v55, %v3206_v53  ;;  %v1846_v58 = vpop.f32.mrb[41].mxu0 }
 0x169   : > { %v3207_v59 = vpop.f32.mrb[42].mxu1  ;;  %v2987_v60 = vpack.c.bf16 %v2161_v54, %v2160_v27  ;;  %v3305_v61 = vadd.f32 %v1846_v58, %v1221_v56  ;;  %v3257_v29 = vpop.f32.mrb[42].mxu0 }
 0x16a   : > { %v1224_v62 = vpop.f32.mrb[43].mxu1  ;;  %3032 = vst [vmem:[%s3734_s4 + $0x98] sm:$0xff] %v2992_v57   ;;  %v2118_v63 = vadd.f32 %v3304_v28, %v3724_v39  ;;  %v3306_v0 = vadd.f32 %v3257_v29, %v3207_v59  ;;  %v1849_v1 = vpop.f32.mrb[43].mxu0 }
 0x16b   : > { %3031 = vst [vmem:[%s3734_s4 + $0x90] sm:$0xff] %v2987_v60   ;;  %v2116_v2 = vadd.f32 %v3305_v61, %v3724_v39  ;;  %v3307_v30 = vadd.f32 %v1849_v1, %v1224_v62 }
 0x16c   : > { %v2119_v3 = vadd.f32 %v3306_v0, %v3724_v39  ;;  %v2166_v4 = vmax.f32 %v2118_v63, 0.0 }
 0x16d   : > { %v2117_v31 = vadd.f32 %v3307_v30, %v3724_v39  ;;  %v2164_v7 = vmax.f32 %v2116_v2, 0.0 }
 0x16e   : > { %v2167_v5 = vmax.f32 %v2119_v3, 0.0 }
 0x16f   : > { %v3210_v6 = vpop.f32.mrb[44].mxu1  ;;  %v2165_v32 = vmax.f32 %v2117_v31, 0.0  ;;  %v3260_v8 = vpop.f32.mrb[44].mxu0 }
 0x170   : > { %v1237_v9 = vpop.f32.mrb[45].mxu1  ;;  %v3002_v10 = vpack.c.bf16 %v2167_v5, %v2166_v4  ;;  %v3308_v11 = vadd.f32 %v3260_v8, %v3210_v6  ;;  %v1862_v33 = vpop.f32.mrb[45].mxu0 }
 0x171   : > { %v3211_v12 = vpop.f32.mrb[46].mxu1  ;;  %v2997_v13 = vpack.c.bf16 %v2165_v32, %v2164_v7  ;;  %v3309_v14 = vadd.f32 %v1862_v33, %v1237_v9  ;;  %v3261_v15 = vpop.f32.mrb[46].mxu0 }
 0x172   : > { %v1240_v16 = vpop.f32.mrb[47].mxu1  ;;  %3034 = vst [vmem:[%s3734_s4 + $0xa8] sm:$0xff] %v3002_v10   ;;  %v2122_v34 = vadd.f32 %v3308_v11, %v3724_v39  ;;  %v3310_v17 = vadd.f32 %v3261_v15, %v3211_v12  ;;  %v1865_v18 = vpop.f32.mrb[47].mxu0 }
 0x173   : > { %3033 = vst [vmem:[%s3734_s4 + $0xa0] sm:$0xff] %v2997_v13   ;;  %v2120_v35 = vadd.f32 %v3309_v14, %v3724_v39  ;;  %v3311_v19 = vadd.f32 %v1865_v18, %v1240_v16 }
 0x174   : > { %v2123_v20 = vadd.f32 %v3310_v17, %v3724_v39  ;;  %v2170_v38 = vmax.f32 %v2122_v34, 0.0 }
 0x175   : > { %v2121_v21 = vadd.f32 %v3311_v19, %v3724_v39  ;;  %v2168_v22 = vmax.f32 %v2120_v35, 0.0 }
 0x176   : > { %v2171_v36 = vmax.f32 %v2123_v20, 0.0 }
 0x177   : > { %v2169_v40 = vmax.f32 %v2121_v21, 0.0 }
 0x178   : > { %v3012_v23 = vpack.c.bf16 %v2171_v36, %v2170_v38 }
 0x179   : > { %v3007_v41 = vpack.c.bf16 %v2169_v40, %v2168_v22 }
 0x17a   : > { %3036 = vst [vmem:[%s3734_s4 + $0xb8] sm:$0xff] %v3012_v23  }
 0x17b   : > { %3035 = vst [vmem:[%s3734_s4 + $0xb0] sm:$0xff] %v3007_v41  }
 0x17c PF: > { %s13_s14 = sadd.s32 1, %s3487_s14   ;;  %s3830_s12 = smov %s3483_s13 }
 0x17d   : > { %p10_p5 = scmp.ge.s32.totalorder %s13_s14, 4   ;;  %s3831_s13 = smov %s3833_s15 }
 0x17f   :  { %12 = sbr.rel (!%p10_p5) target bundleno = 2 (0x2), region = 73 }

</bundles_post_ra>
